<compile_context>
chip_gen: v7x
topology: tpu7x:2x2x1
jax: 0.10.0
libtpu: 0.0.40
codegen_flags: <defaults>
</compile_context>

<pallas_src>
import functools

import jax
import jax.numpy as jnp
from jax.experimental import pallas as pl
from jax.experimental.pallas import tpu as pltpu

BN_EPS = 1e-5
LANE = 128
SUBLANE = 8


def _round_up(n, m):
    return (n + m - 1) // m * m


# ---------------------------------------------------------------------------
# Fused MLP kernel:
#   h = relu(x @ W1 + b1); ...; h = relu(h @ WL + bL)
#   out = sum(h * w_final_row, axis=-1, keepdims=True) + b_final   (lane reduction)
# (BatchNorm affines are pre-folded into W/b on the host, Dropout is identity.)
# ---------------------------------------------------------------------------
def _mlp_fused_kernel(n_hidden, *refs):
    # refs = (x_ref, w_1, b_1, ..., w_L, b_L, wf_ref, bf_ref, o_ref)
    x_ref = refs[0]
    o_ref = refs[-1]

    h = x_ref[...].astype(jnp.float32)
    idx = 1
    for _ in range(n_hidden):
        w = refs[idx][...]
        b = refs[idx + 1][...]
        idx += 2
        z = jnp.dot(h.astype(w.dtype), w, preferred_element_type=jnp.float32)
        h = jnp.maximum(z + b.astype(jnp.float32), 0.0)

    wf = refs[idx][...].astype(jnp.float32)       # (1, K_last_padded) row vector
    bf = refs[idx + 1][...].astype(jnp.float32)   # (1, 1)
    out = jnp.sum(h * wf, axis=-1, keepdims=True) + bf
    o_ref[...] = out.astype(o_ref.dtype)


# ---------------------------------------------------------------------------
# Parameter construction / folding / padding
# ---------------------------------------------------------------------------
def init_params(key, input_size, hidden_sizes):
    """Deterministic synthetic parameters matching GradeNN.__init__ shapes (eval mode)."""
    params = []
    prev = input_size
    for h in hidden_sizes:
        key, kw, kb, kg, kbe, km, kv = jax.random.split(key, 7)
        layer = dict(
            # PyTorch Linear weight is (out, in); we store the transpose (in, out).
            w=jax.random.normal(kw, (prev, h), jnp.float32) * (1.0 / jnp.sqrt(prev)),
            b=jax.random.normal(kb, (1, h), jnp.float32) * 0.1,
            gamma=1.0 + 0.1 * jax.random.normal(kg, (1, h), jnp.float32),
            beta=0.1 * jax.random.normal(kbe, (1, h), jnp.float32),
            mean=0.1 * jax.random.normal(km, (1, h), jnp.float32),
            var=jnp.abs(jax.random.normal(kv, (1, h), jnp.float32)) + 0.5,
        )
        params.append(layer)
        prev = h
    key, kw, kb = jax.random.split(key, 3)
    final = dict(
        w=jax.random.normal(kw, (prev, 1), jnp.float32) * (1.0 / jnp.sqrt(prev)),
        b=jax.random.normal(kb, (1, 1), jnp.float32) * 0.1,
    )
    return params, final


def prepare_params(hidden_params, final_params, compute_dtype=jnp.float32):
    """Fold eval-mode BatchNorm into the *next* Linear and zero-pad features to 128 lanes.

    BN(relu(z)) = relu(z) * s + t  with  s = gamma * rsqrt(var + eps), t = beta - mean * s.
    Since (r*s + t) @ W + b == r @ (diag(s) W) + (t @ W + b), each hidden layer's BN folds
    exactly into the following layer's weights/bias (and the last BN into the final Linear).
    """
    layers = []
    s_prev = None   # (1, h_prev)
    t_prev = None   # (1, h_prev)
    prev = hidden_params[0]["w"].shape[0] if hidden_params else final_params["w"].shape[0]
    prev_pad = _round_up(prev, LANE)

    for p in hidden_params:
        w = p["w"].astype(jnp.float32)        # (prev, h)
        b = p["b"].astype(jnp.float32)        # (1, h)
        if s_prev is not None:
            b = t_prev @ p["w"].astype(jnp.float32) + b
            w = s_prev.reshape(-1, 1) * w
        h = w.shape[1]
        h_pad = _round_up(h, LANE)
        w_p = jnp.zeros((prev_pad, h_pad), jnp.float32).at[:prev, :h].set(w)
        b_p = jnp.zeros((1, h_pad), jnp.float32).at[:, :h].set(b)
        layers.append((w_p.astype(compute_dtype), b_p))   # bias kept f32

        s_prev = p["gamma"] * jax.lax.rsqrt(p["var"] + BN_EPS)   # (1, h)
        t_prev = p["beta"] - p["mean"] * s_prev                  # (1, h)
        prev, prev_pad = h, h_pad

    wf = final_params["w"].astype(jnp.float32)    # (prev, 1)
    bf = final_params["b"].astype(jnp.float32)    # (1, 1)
    if s_prev is not None:
        bf = t_prev @ final_params["w"].astype(jnp.float32) + bf
        wf = s_prev.reshape(-1, 1) * wf
    wf_row = jnp.zeros((1, prev_pad), jnp.float32).at[:, :prev].set(wf.T)

    return dict(layers=layers, wf=wf_row.astype(compute_dtype), bf=bf)


# ---------------------------------------------------------------------------
# Forward pass: single fused pallas_call over a batch-tiled grid.
# ---------------------------------------------------------------------------
def grade_nn_forward(x, params, *, batch_tile=256):
    layers = params["layers"]
    wf = params["wf"]
    bf = params["bf"]
    n_hidden = len(layers)

    b_orig, k = x.shape
    k_pad = layers[0][0].shape[0] if n_hidden else wf.shape[1]

    # Batch tile: multiple of 8 sublanes; grid shards batch tiles across cores (v7x).
    tm = min(_round_up(b_orig, SUBLANE), batch_tile)
    b_pad = _round_up(b_orig, tm)
    xp = jnp.zeros((b_pad, k_pad), jnp.float32).at[:b_orig, :k].set(x.astype(jnp.float32))

    operands = [xp]
    in_specs = [pl.BlockSpec((tm, k_pad), lambda i: (i, 0))]
    for w, b in layers:
        operands += [w, b]
        # Constant index_map -> weights/bias stay VMEM-resident across batch tiles.
        in_specs += [pl.BlockSpec(w.shape, lambda i: (0, 0)),
                     pl.BlockSpec(b.shape, lambda i: (0, 0))]
    operands += [wf, bf]
    in_specs += [pl.BlockSpec(wf.shape, lambda i: (0, 0)),
                 pl.BlockSpec(bf.shape, lambda i: (0, 0))]

    out = pl.pallas_call(
        functools.partial(_mlp_fused_kernel, n_hidden),
        out_shape=jax.ShapeDtypeStruct((b_pad, 1), jnp.float32),
        grid_spec=pltpu.PrefetchScalarGridSpec(
            num_scalar_prefetch=0,
            grid=(b_pad // tm,),
            in_specs=in_specs,
            out_specs=pl.BlockSpec((tm, 1), lambda i: (i, 0)),
        ),
        compiler_params=pltpu.CompilerParams(
            dimension_semantics=("parallel",)),
    )(*operands)
    return out[:b_orig]


def _reference_forward(x, hidden_params, final_params):
    """Pure-JAX reference with the original (unfolded) eval-mode math."""
    h = x
    for p in hidden_params:
        h = jnp.maximum(h @ p["w"] + p["b"], 0.0)
        h = (h - p["mean"]) * jax.lax.rsqrt(p["var"] + BN_EPS) * p["gamma"] + p["beta"]
    return h @ final_params["w"] + final_params["b"]


if __name__ == "__main__":
    batch = 8
    input_size = 16
    hidden_sizes = [32, 64]

    key = jax.random.PRNGKey(0)
    key, kx = jax.random.split(key)
    x = jax.random.normal(kx, (batch, input_size), jnp.float32)

    hidden_params, final_params = init_params(key, input_size, hidden_sizes)
    ref = _reference_forward(x, hidden_params, final_params)

    fwd = jax.jit(grade_nn_forward)

    # f32 path (matches the PyTorch module's fp32 semantics).
    prepared_f32 = prepare_params(hidden_params, final_params, compute_dtype=jnp.float32)
    out = jax.block_until_ready(fwd(x, prepared_f32))
    assert out.shape == (batch, 1), out.shape
    assert jnp.allclose(out, ref, atol=1e-4, rtol=1e-4), (out, ref)

    # Optional bf16-weights-on-MXU path (f32 accumulation). Loose sanity bound only,
    # since bf16 input rounding is outside the fp32 module's tolerance.
    prepared_bf16 = prepare_params(hidden_params, final_params, compute_dtype=jnp.bfloat16)
    out_bf16 = jax.block_until_ready(fwd(x, prepared_bf16))
    assert out_bf16.shape == (batch, 1)
    assert bool(jnp.all(jnp.isfinite(out_bf16)))
    assert jnp.allclose(out_bf16, ref, atol=0.2, rtol=0.1), (out_bf16, ref)

    print("KERNEL_OK")
</pallas_src>

<mosaic_0001>
module attributes {stable_mosaic.version = 11 : i64} {
  func.func @_mlp_fused_kernel(%arg0: i32, %arg1: memref<8x128xf32, #tpu.memory_space<vmem>>, %arg2: memref<128x128xf32, #tpu.memory_space<vmem>>, %arg3: memref<1x128xf32, #tpu.memory_space<vmem>>, %arg4: memref<128x128xf32, #tpu.memory_space<vmem>>, %arg5: memref<1x128xf32, #tpu.memory_space<vmem>>, %arg6: memref<1x128xf32, #tpu.memory_space<vmem>>, %arg7: memref<1x1xf32, #tpu.memory_space<vmem>>, %arg8: memref<8x1xf32, #tpu.memory_space<vmem>>) attributes {dimension_semantics = [#tpu.dimension_semantics<parallel>], iteration_bounds = array<i64: 1>, scalar_prefetch = 0 : i64, scratch_operands = 0 : i64, tpu.core_type = #tpu.core_type<tc>, window_params = [{transform_indices = @transform_0, window_bounds = array<i64: 8, 128>}, {pipeline_mode = #tpu.pipeline_mode<synchronous>, transform_indices = @transform_1, window_bounds = array<i64: 128, 128>}, {pipeline_mode = #tpu.pipeline_mode<synchronous>, transform_indices = @transform_2, window_bounds = array<i64: 1, 128>}, {pipeline_mode = #tpu.pipeline_mode<synchronous>, transform_indices = @transform_3, window_bounds = array<i64: 128, 128>}, {pipeline_mode = #tpu.pipeline_mode<synchronous>, transform_indices = @transform_4, window_bounds = array<i64: 1, 128>}, {pipeline_mode = #tpu.pipeline_mode<synchronous>, transform_indices = @transform_5, window_bounds = array<i64: 1, 128>}, {pipeline_mode = #tpu.pipeline_mode<synchronous>, transform_indices = @transform_6, window_bounds = array<i64: 1, 1>}, {transform_indices = @transform_7, window_bounds = array<i64: 8, 1>}]} {
    %c0 = arith.constant 0 : index
    %c0_0 = arith.constant 0 : index
    %0 = vector.load %arg1[%c0, %c0_0] : memref<8x128xf32, #tpu.memory_space<vmem>>, vector<8x128xf32>
    %c0_1 = arith.constant 0 : index
    %c0_2 = arith.constant 0 : index
    %1 = vector.load %arg2[%c0_1, %c0_2] : memref<128x128xf32, #tpu.memory_space<vmem>>, vector<128x128xf32>
    %c0_3 = arith.constant 0 : index
    %c0_4 = arith.constant 0 : index
    %2 = vector.load %arg3[%c0_3, %c0_4] : memref<1x128xf32, #tpu.memory_space<vmem>>, vector<1x128xf32>
    %cst = arith.constant dense<0.000000e+00> : vector<8x128xf32>
    %3 = tpu.matmul %0, %1, %cst {dimension_numbers = #tpu.dot_dimension_numbers<[1], [0], [0], [1], [0, 0, 1, 1], [], []>} : vector<8x128xf32>, vector<128x128xf32>, vector<8x128xf32> -> vector<8x128xf32>
    %4 = vector.broadcast %2 : vector<1x128xf32> to vector<8x128xf32>
    %5 = arith.addf %3, %4 : vector<8x128xf32>
    %cst_5 = arith.constant 0.000000e+00 : f32
    %6 = vector.broadcast %cst_5 : f32 to vector<8x128xf32>
    %7 = arith.maximumf %5, %6 : vector<8x128xf32>
    %c0_6 = arith.constant 0 : index
    %c0_7 = arith.constant 0 : index
    %8 = vector.load %arg4[%c0_6, %c0_7] : memref<128x128xf32, #tpu.memory_space<vmem>>, vector<128x128xf32>
    %c0_8 = arith.constant 0 : index
    %c0_9 = arith.constant 0 : index
    %9 = vector.load %arg5[%c0_8, %c0_9] : memref<1x128xf32, #tpu.memory_space<vmem>>, vector<1x128xf32>
    %cst_10 = arith.constant dense<0.000000e+00> : vector<8x128xf32>
    %10 = tpu.matmul %7, %8, %cst_10 {dimension_numbers = #tpu.dot_dimension_numbers<[1], [0], [0], [1], [0, 0, 1, 1], [], []>} : vector<8x128xf32>, vector<128x128xf32>, vector<8x128xf32> -> vector<8x128xf32>
    %11 = vector.broadcast %9 : vector<1x128xf32> to vector<8x128xf32>
    %12 = arith.addf %10, %11 : vector<8x128xf32>
    %cst_11 = arith.constant 0.000000e+00 : f32
    %13 = vector.broadcast %cst_11 : f32 to vector<8x128xf32>
    %14 = arith.maximumf %12, %13 : vector<8x128xf32>
    %c0_12 = arith.constant 0 : index
    %c0_13 = arith.constant 0 : index
    %15 = vector.load %arg6[%c0_12, %c0_13] : memref<1x128xf32, #tpu.memory_space<vmem>>, vector<1x128xf32>
    %c0_14 = arith.constant 0 : index
    %c0_15 = arith.constant 0 : index
    %16 = vector.load %arg7[%c0_14, %c0_15] : memref<1x1xf32, #tpu.memory_space<vmem>>, vector<1x1xf32>
    %17 = vector.broadcast %15 : vector<1x128xf32> to vector<8x128xf32>
    %18 = arith.mulf %14, %17 : vector<8x128xf32>
    %cst_16 = arith.constant dense<0.000000e+00> : vector<8xf32>
    %19 = vector.multi_reduction <add>, %18, %cst_16 [1] : vector<8x128xf32> to vector<8xf32>
    %20 = vector.shape_cast %19 : vector<8xf32> to vector<8x1xf32>
    %21 = vector.broadcast %16 : vector<1x1xf32> to vector<8x1xf32>
    %22 = arith.addf %20, %21 : vector<8x1xf32>
    %c0_17 = arith.constant 0 : index
    %c0_18 = arith.constant 0 : index
    %23 = vector.load %arg8[%c0_17, %c0_18] : memref<8x1xf32, #tpu.memory_space<vmem>>, vector<8x1xf32>
    tpu.vector_store %arg8[%c0_17, %c0_18], %22 {strides = array<i32>} : memref<8x1xf32, #tpu.memory_space<vmem>>, vector<8x1xf32>,
    return
  }
  func.func @transform_0(%arg0: i32) -> (i32, i32) {
    %c0_i32 = arith.constant 0 : i32
    %c0_i32_0 = arith.constant 0 : i32
    return %arg0, %c0_i32 : i32, i32
  }
  func.func @transform_1(%arg0: i32) -> (i32, i32) {
    %c0_i32 = arith.constant 0 : i32
    %c0_i32_0 = arith.constant 0 : i32
    %c0_i32_1 = arith.constant 0 : i32
    return %c0_i32, %c0_i32_0 : i32, i32
  }
  func.func @transform_2(%arg0: i32) -> (i32, i32) {
    %c0_i32 = arith.constant 0 : i32
    %c0_i32_0 = arith.constant 0 : i32
    %c0_i32_1 = arith.constant 0 : i32
    return %c0_i32, %c0_i32_0 : i32, i32
  }
  func.func @transform_3(%arg0: i32) -> (i32, i32) {
    %c0_i32 = arith.constant 0 : i32
    %c0_i32_0 = arith.constant 0 : i32
    %c0_i32_1 = arith.constant 0 : i32
    return %c0_i32, %c0_i32_0 : i32, i32
  }
  func.func @transform_4(%arg0: i32) -> (i32, i32) {
    %c0_i32 = arith.constant 0 : i32
    %c0_i32_0 = arith.constant 0 : i32
    %c0_i32_1 = arith.constant 0 : i32
    return %c0_i32, %c0_i32_0 : i32, i32
  }
  func.func @transform_5(%arg0: i32) -> (i32, i32) {
    %c0_i32 = arith.constant 0 : i32
    %c0_i32_0 = arith.constant 0 : i32
    %c0_i32_1 = arith.constant 0 : i32
    return %c0_i32, %c0_i32_0 : i32, i32
  }
  func.func @transform_6(%arg0: i32) -> (i32, i32) {
    %c0_i32 = arith.constant 0 : i32
    %c0_i32_0 = arith.constant 0 : i32
    %c0_i32_1 = arith.constant 0 : i32
    return %c0_i32, %c0_i32_0 : i32, i32
  }
  func.func @transform_7(%arg0: i32) -> (i32, i32) {
    %c0_i32 = arith.constant 0 : i32
    %c0_i32_0 = arith.constant 0 : i32
    return %arg0, %c0_i32 : i32, i32
  }
}

</mosaic_0001>

<bundles_post_ra>
// kernel: grade_nn_forward.1
= control target key start
LH: loop header
LB: loop body
LE: loop exit
PB: predicated region body
PF: predicated region fallthrough
CT: control target
= control target key end

     0   :  { %s587_s0 = inlined_call_operand.vmem [shape: f32[8,128], index: 0, kind: input, shape index: {}]   ;;  %s588_s1 = inlined_call_operand.hbm [shape: f32[128,128], index: 1, kind: input, shape index: {}]   ;;  %s589_s2 = inlined_call_operand.vmem [shape: f32[1,128], index: 2, kind: input, shape index: {}]   ;;  %s590_s3 = inlined_call_operand.hbm [shape: f32[128,128], index: 3, kind: input, shape index: {}]   ;;  %s591_s4 = inlined_call_operand.vmem [shape: f32[1,128], index: 4, kind: input, shape index: {}]   ;;  %s592_s5 = inlined_call_operand.vmem [shape: f32[1,128], index: 5, kind: input, shape index: {}]   ;;  %s593_s6 = inlined_call_operand.<no memory space> [shape: f32[1,1], index: 6, kind: input, shape index: {}]   ;;  %s594_s7 = inlined_call_operand.vmem [shape: f32[8,1], index: 7, kind: output, shape index: {}]  }
   0x1   :  { %v12_v0 = vstv %s593_s6 }
   0x2   :  { %13 = vst [vmem:[#allocation2] sm:$0x1] %v12_v0 }
   0x3   :  { %14 = vsyncpa [#allocation4], 0 }
   0x4   :  { %15 = vsyncpa [#allocation6], 0  ;;  %s482_s26 = smov [#allocation3]   ;;  %s434_s30 = scalar_lea.hbm %s588_s1, 2048 }
   0x5   :  { %s23_s27 = sshll.u32 %s482_s26, 4  ;;  %p435_p0 = scmp.ne.s32.totalorder %s588_s1, %s434_s30  ;;  %s24_s27 = int_to_ptr.vmem [resolvable:$true] %s23_s27 }
   0x6   :  { %p438_p1 = scmp.lt.u32.totalorder %s434_s30, %s588_s1 }
   0x8   :  { %p440_p2 = pnand %p438_p1, %p435_p0 }
   0xa   :  { %443 = shalt.err (!%p440_p2)
}
   0xb   :  { %s444_s6 = scalar_lea.vmem %s24_s27, 2048  ;;  %p449_p4 = scmp.lt.s32.totalorder %s24_s27, %s24_s27 }
   0xc   :  { %p445_p3 = scmp.ne.s32.totalorder %s24_s27, %s444_s6  ;;  %p450_p5 = scmp.lt.s32.totalorder %s444_s6, %s444_s6 }
   0xe   :  { %p451_p6 = por %p450_p5, %p449_p4 }
  0x10   :  { %p452_p7 = pnand %p451_p6, %p445_p3 }
  0x12   :  { %455 = shalt.err (!%p452_p7)
}
  0x13   :  { %s483_s12 = smov 128   ;;  %s484_s13 = smov 8  }
  0x14   :  { %29 = dma.hbm_to_vmem [thread:$0]  %s588_s1, 2048, %s24_s27, [#allocation4], %s483_s12, %s483_s12, %s484_s13  }
  0x15   :  { %s485_s16 = smov [#allocation5]   ;;  %s456_s20 = scalar_lea.hbm %s590_s3, 2048 }
  0x16   :  { %s37_s17 = sshll.u32 %s485_s16, 4  ;;  %p457_p8 = scmp.ne.s32.totalorder %s590_s3, %s456_s20  ;;  %s38_s17 = int_to_ptr.vmem [resolvable:$true] %s37_s17 }
  0x17   :  { %p460_p9 = scmp.lt.u32.totalorder %s456_s20, %s590_s3 }
  0x19   :  { %p462_p10 = pnand %p460_p9, %p457_p8 }
  0x1b   :  { %465 = shalt.err (!%p462_p10)
}
  0x1c   :  { %s466_s25 = scalar_lea.vmem %s38_s17, 2048  ;;  %p471_p12 = scmp.lt.s32.totalorder %s38_s17, %s38_s17 }
  0x1d   :  { %p467_p11 = scmp.ne.s32.totalorder %s38_s17, %s466_s25  ;;  %p472_p13 = scmp.lt.s32.totalorder %s466_s25, %s466_s25 }
  0x1f   :  { %p473_p0 = por %p472_p13, %p471_p12 }
  0x21   :  { %p474_p1 = pnand %p473_p0, %p467_p11 }
  0x23   :  { %477 = shalt.err (!%p474_p1)
}
  0x24   :  { %43 = dma.hbm_to_vmem [thread:$0]  %s590_s3, 2048, %s38_s17, [#allocation6], %s483_s12, %s483_s12, %s484_s13  }
  0x25   :  { %478 = dma.done.wait [#allocation4], 2048  }
  0x26   :  { %479 = vsyncadd [#allocation4], 4294965248 }
  0x27   :  { %480 = dma.done.wait [#allocation6], 2048  }
  0x28   :  { %481 = vsyncadd [#allocation6], 4294965248  ;;  %v486_v1 = vmov 0.0|0.0   ;;  %vm487_vm0 = vmmov 0   ;;  %v488_v2 = vmov 0.0   ;;  %v57_v3 = vld [vmem:[#allocation3] sm:$0xff] }
  0x29   :  { %379 = vmatprep.subr.bf16.mxu0 %v486_v1  ;;  %341 = vmatprep.mubr.msk.f32.mxu0 %vm487_vm0, %v488_v2  ;;  %v58_v4 = vld [vmem:[#allocation3 + $0x8] sm:$0xff]  ;;  %v59_v5 = vld [vmem:[#allocation3 + $0x10] sm:$0xff]  ;;  %v60_v7 = vld [vmem:[#allocation3 + $0x18] sm:$0xff]  ;;  %vm263_vm1 = vcmask 7168  }
  0x2a   :  { %403 = vmatprep.subr.bf16.mxu1 %v486_v1  ;;  %376 = vmatprep.mubr.msk.f32.mxu1 %vm487_vm0, %v488_v2  ;;  %v380_v6 = vpack.c.bf16 %v58_v4, %v57_v3  ;;  %v383_v8 = vpack.c.bf16 %v60_v7, %v59_v5  ;;  %v61_v9 = vld [vmem:[#allocation3 + $0x20] sm:$0xff]  ;;  %v62_v10 = vld [vmem:[#allocation3 + $0x28] sm:$0xff]  ;;  %v153_v13 = vld [vmem:[#allocation5 + $0x10] sm:$0xff] }
  0x2b   :  { %v151_v11 = vld [vmem:[#allocation5] sm:$0xff]  ;;  %v152_v12 = vld [vmem:[#allocation5 + $0x8] sm:$0xff]  ;;  %v154_v14 = vld [vmem:[#allocation5 + $0x18] sm:$0xff]  ;;  %v386_v15 = vpack.c.bf16 %v62_v10, %v61_v9 }
  0x2c   :  { %381 = vmatpush3.bf16.msra.mxu0 %v380_v6  ;;  %v404_v16 = vpack.c.bf16 %v152_v12, %v151_v11  ;;  %v63_v17 = vld [vmem:[#allocation3 + $0x30] sm:$0xff]  ;;  %v64_v18 = vld [vmem:[#allocation3 + $0x38] sm:$0xff]  ;;  %v407_v19 = vpack.c.bf16 %v154_v14, %v153_v13  ;;  %v155_v20 = vld [vmem:[#allocation5 + $0x20] sm:$0xff] }
  0x2d   :  { %382 = vmatprep.subr.bf16.mxu0 %v486_v1  ;;  %v156_v21 = vld [vmem:[#allocation5 + $0x28] sm:$0xff]  ;;  %v389_v22 = vpack.c.bf16 %v64_v18, %v63_v17  ;;  %v65_v23 = vld [vmem:[#allocation3 + $0x40] sm:$0xff]  ;;  %v157_v26 = vld [vmem:[#allocation5 + $0x30] sm:$0xff] }
  0x2e   :  { %405 = vmatpush3.bf16.msra.mxu1 %v404_v16  ;;  %v66_v24 = vld [vmem:[#allocation3 + $0x48] sm:$0xff]  ;;  %v410_v25 = vpack.c.bf16 %v156_v21, %v155_v20  ;;  %v158_v27 = vld [vmem:[#allocation5 + $0x38] sm:$0xff]  ;;  %v67_v29 = vld [vmem:[#allocation3 + $0x50] sm:$0xff] }
  0x2f   :  { %406 = vmatprep.subr.bf16.mxu1 %v486_v1  ;;  %v392_v28 = vpack.c.bf16 %v66_v24, %v65_v23  ;;  %v68_v30 = vld [vmem:[#allocation3 + $0x58] sm:$0xff]  ;;  %v413_v31 = vpack.c.bf16 %v158_v27, %v157_v26  ;;  %v159_v32 = vld [vmem:[#allocation5 + $0x40] sm:$0xff]  ;;  %v160_v33 = vld [vmem:[#allocation5 + $0x48] sm:$0xff] }
  0x30   :  { %384 = vmatpush3.bf16.msra.mxu0 %v383_v8  ;;  %v395_v34 = vpack.c.bf16 %v68_v30, %v67_v29  ;;  %v69_v35 = vld [vmem:[#allocation3 + $0x60] sm:$0xff]  ;;  %v70_v36 = vld [vmem:[#allocation3 + $0x68] sm:$0xff]  ;;  %v416_v37 = vpack.c.bf16 %v160_v33, %v159_v32  ;;  %v161_v38 = vld [vmem:[#allocation5 + $0x50] sm:$0xff] }
  0x31   :  { %385 = vmatprep.subr.bf16.mxu0 %v486_v1  ;;  %v162_v39 = vld [vmem:[#allocation5 + $0x58] sm:$0xff]  ;;  %v398_v40 = vpack.c.bf16 %v70_v36, %v69_v35  ;;  %v71_v41 = vld [vmem:[#allocation3 + $0x70] sm:$0xff]  ;;  %v163_v44 = vld [vmem:[#allocation5 + $0x60] sm:$0xff] }
  0x32   :  { %408 = vmatpush3.bf16.msra.mxu1 %v407_v19  ;;  %v72_v42 = vld [vmem:[#allocation3 + $0x78] sm:$0xff]  ;;  %v419_v43 = vpack.c.bf16 %v162_v39, %v161_v38  ;;  %v164_v45 = vld [vmem:[#allocation5 + $0x68] sm:$0xff]  ;;  %v165_v49 = vld [vmem:[#allocation5 + $0x70] sm:$0xff] }
  0x33   :  { %409 = vmatprep.subr.bf16.mxu1 %v486_v1  ;;  %v401_v46 = vpack.c.bf16 %v72_v42, %v71_v41  ;;  %v422_v47 = vpack.c.bf16 %v164_v45, %v163_v44  ;;  %v56_v48 = vld [vmem:[%s587_s0] sm:$0xff] }
  0x34   :  { %387 = vmatpush3.bf16.msra.mxu0 %v386_v15  ;;  %v166_v50 = vld [vmem:[#allocation5 + $0x78] sm:$0xff] }
  0x35   :  { %388 = vmatprep.subr.bf16.mxu0 %v486_v1  ;;  %v425_v51 = vpack.c.bf16 %v166_v50, %v165_v49  ;;  %v271_v52 = vld [vmem:[%s589_s2] ss:$0 sm:$0xff] }
  0x36   :  { %411 = vmatpush3.bf16.msra.mxu1 %v410_v25  ;;  %v272_v57 = vld [vmem:[%s591_s4] ss:$0 sm:$0xff] }
  0x37   :  { %412 = vmatprep.subr.bf16.mxu1 %v486_v1  ;;  %v273_v61 = vld [vmem:[%s592_s5] ss:$0 sm:$0xff] }
  0x38   :  { %390 = vmatpush3.bf16.msra.mxu0 %v389_v22  ;;  %v274_v0 = vld [vmem:[#allocation2] ss:$0 sm:$0xff] }
  0x39   :  { %391 = vmatprep.subr.bf16.mxu0 %v486_v1 }
  0x3a   :  { %414 = vmatpush3.bf16.msra.mxu1 %v413_v31 }
  0x3b   :  { %415 = vmatprep.subr.bf16.mxu1 %v486_v1 }
  0x3c   :  { %393 = vmatpush3.bf16.msra.mxu0 %v392_v28 }
  0x3d   :  { %394 = vmatprep.subr.bf16.mxu0 %v486_v1 }
  0x3e   :  { %417 = vmatpush3.bf16.msra.mxu1 %v416_v37 }
  0x3f   :  { %418 = vmatprep.subr.bf16.mxu1 %v486_v1 }
  0x40   :  { %396 = vmatpush3.bf16.msra.mxu0 %v395_v34 }
  0x41   :  { %397 = vmatprep.subr.bf16.mxu0 %v486_v1 }
  0x42   :  { %420 = vmatpush3.bf16.msra.mxu1 %v419_v43 }
  0x43   :  { %421 = vmatprep.subr.bf16.mxu1 %v486_v1 }
  0x44   :  { %399 = vmatpush3.bf16.msra.mxu0 %v398_v40 }
  0x45   :  { %400 = vmatprep.subr.bf16.mxu0 %v486_v1 }
  0x46   :  { %423 = vmatpush3.bf16.msra.mxu1 %v422_v47 }
  0x47   :  { %424 = vmatprep.subr.bf16.mxu1 %v486_v1 }
  0x48   :  { %402 = vmatpush3.bf16.msra.mxu0 %v401_v46 }
  0x4a   :  { %426 = vmatpush3.bf16.msra.mxu1 %v425_v51 }
  0x4b   :  { %342 = vmatmul.mubr.f32.vlgmr.msra.gmra.mrb[0].mxu0 %v56_v48 }
 0x11e   :  { %v146_v53 = vpop.f32.mrb[0].mxu0 }
 0x11f   :  { %v147_v54 = vadd.f32 %v271_v52, %v146_v53  ;;  %v343_v55 = vpop.f32.mrb[1].mxu0 }
 0x121   :  { %v150_v56 = vmax.f32 %v147_v54, 0.0 }
 0x123   :  { %377 = vmatmul.mubr.f32.vlgmr.msra.gmra.mrb[0].mxu1 %v150_v56 }
 0x1f6   :  { %v240_v58 = vpop.f32.mrb[0].mxu1 }
 0x1f7   :  { %v241_v59 = vadd.f32 %v272_v57, %v240_v58  ;;  %v378_v60 = vpop.f32.mrb[1].mxu1 }
 0x1f9   :  { %v244_v62 = vmax.f32 %v241_v59, 0.0 }
 0x1fb   :  { %v253_v63 = vmul.f32 %v273_v61, %v244_v62 }
 0x1fd   :  { %254 = vadd.xlane.f32.xlu0 %v253_v63 }
 0x28a   :  { %v255_v1 = vpop.xlane.xlu0 %254 }
 0x28b   :  { %v262_v2 = vadd.f32 %v274_v0, %v255_v1 }
 0x28d   :  { %264 = vst.msk [vmem:[%s594_s7] sm:$0xff] %vm263_vm1, %v262_v2 }
 0x28e   :  { %269 = vsyncpa [#allocation4], 1 }
 0x28f   :  { %270 = vsyncpa [#allocation6], 1 }

</bundles_post_ra>
